<compile_context>
chip_gen: v7x
topology: tpu7x:2x2x1
jax: 0.10.0
libtpu: 0.0.40
codegen_flags: <defaults>
</compile_context>

<pallas_src>
import jax
import jax.numpy as jnp
from jax.experimental import pallas as pl
from jax.experimental.pallas import tpu as pltpu


def autopad(k, p=None, d=1):
    if d > 1:
        k = d * (k - 1) + 1 if isinstance(k, int) else [d * (x - 1) + 1 for x in k]
    if p is None:
        p = k // 2 if isinstance(k, int) else [x // 2 for x in k]
    return p


def _round_up(a, b):
    return ((a + b - 1) // b) * b


def _next_pow2(n):
    p = 1
    while p < n:
        p *= 2
    return p


def _conv_bn_silu_kernel(p_ref, w_ref, bias_ref, o_ref):
    # p_ref:    (1, TILE_MP, G*KKC1)  bf16 packed im2col patches
    # w_ref:    (G*KKC1, TILE_C)      bf16 block-diag weights (BN scale folded)
    # bias_ref: (1, TILE_C)           f32 folded BN bias, tiled per packed pixel
    # o_ref:    (1, TILE_MP, TILE_C)  bf16 packed output slab (lane-dense)
    acc = jnp.dot(p_ref[0], w_ref[...], preferred_element_type=jnp.float32)
    y = acc + bias_ref[...]            # f32 epilogue (v5e has no bf16 VPU/EUP)
    y = y * jax.nn.sigmoid(y)          # SiLU
    o_ref[0] = y.astype(o_ref.dtype)


def conv_bn_silu_pallas(x_nchw, weight_oihw, gamma, beta, running_mean,
                        running_var, *, eps=1e-5, stride=1, dilation=1,
                        groups=1, out_dtype=jnp.bfloat16, tile_rows=None,
                        vmem_limit_bytes=32 * 1024 * 1024):
    """Forward of `Conv` (conv -> eval BN -> SiLU). Only the module defaults
    stride=1, dilation=1, groups=1 and odd k are supported in-kernel."""
    c2, c1_w, k, k2 = weight_oihw.shape
    N, c1, H, W = x_nchw.shape
    assert k == k2, "only square kernels supported"
    assert k % 2 == 1, "im2col path assumes odd k (autopad 'same' output)"
    assert stride == 1 and dilation == 1 and groups == 1, \
        "only stride=1, dilation=1, groups=1 implemented"
    assert c1 == c1_w, "input channels mismatch"
    p = autopad(k, None, dilation)
    M = H * W
    kkc1 = k * k * c1

    # ---- glue (plain JAX / XLA): BN fold, layout, im2col ----
    scale = gamma.astype(jnp.float32) / jnp.sqrt(
        running_var.astype(jnp.float32) + eps)
    bias = beta.astype(jnp.float32) - running_mean.astype(jnp.float32) * scale

    # cast to bf16 BEFORE pad / im2col so the glue moves half the bytes.
    x = jnp.transpose(x_nchw, (0, 2, 3, 1)).astype(jnp.bfloat16)     # NHWC
    x_pad = jnp.pad(x, ((0, 0), (p, p), (p, p), (0, 0)))
    taps = [x_pad[:, kh:kh + H, kw:kw + W, :]
            for kh in range(k) for kw in range(k)]
    patches = jnp.concatenate(taps, axis=-1).reshape(N, M, kkc1)     # bf16

    # ---- channel padding / pixel packing (kills write amplification) ----
    if c2 >= 128:
        c2r = _round_up(c2, 128)
        G = 1
    else:
        c2r = _next_pow2(c2)
        G = 128 // c2r
        while G > 1 and G * kkc1 > 16384:   # bound block-diag weight VMEM/flops
            G //= 2
        c2r = 128 // G                      # keep packed lane width at 128
    Cp = G * c2r                            # packed lane width (multiple of 128)
    Gk = G * kkc1                           # packed contraction dim

    # weights: OIHW -> (K*K*C1, C2); fold BN scale; pad to c2r; block-diag so a
    # single matmul produces G pixels' channels per 128-wide output row.
    w = jnp.transpose(weight_oihw, (2, 3, 1, 0)).reshape(kkc1, c2)
    w = w.astype(jnp.float32) * scale[None, :]
    w = jnp.pad(w, ((0, 0), (0, c2r - c2)))
    w_big = jnp.kron(jnp.eye(G, dtype=jnp.float32), w).astype(jnp.bfloat16)
    bias_p = jnp.tile(jnp.pad(bias, (0, c2r - c2)), G).reshape(1, Cp)  # f32

    # ---- column (output-channel) tiling for large c2 ----
    cand = [c for c in (Cp, 512, 256, 128) if c <= Cp and Cp % c == 0]
    tile_c = cand[-1]
    for c in cand:   # largest tile whose (double-buffered) weight slab fits
        if 2 * Gk * c * 2 <= vmem_limit_bytes // 3:
            tile_c = c
            break

    # ---- row (packed pixel-group) tiling from a VMEM budget ----
    Mp = _round_up(M, G) // G               # packed rows per image
    out_bytes = 2 if out_dtype in (jnp.bfloat16, jnp.float16) else 4
    if tile_rows is None:
        budget = int(0.7 * vmem_limit_bytes)
        per_row = 4 * Gk + 2 * tile_c * out_bytes + 4 * tile_c
        fixed = 2 * Gk * tile_c * 2 + 2 * tile_c * 4
        t = max((budget - fixed) // per_row, 8)
        t = min(t, 2048, _round_up(Mp, 8))
        for align in (256, 16, 8):          # 256-row multiples for v6e/v7x MXU
            if t >= align and _round_up(Mp, align) - Mp <= max(Mp // 8, 8):
                break
        t = max(align, t - t % align)
        tile_mp = min(t, _round_up(Mp, align))
        # keep >= 2 grid points so v7x's 2 TensorCores both get work.
        n_grid = N * (-(-Mp // tile_mp)) * (Cp // tile_c)
        if n_grid < 2 and tile_mp >= 16:
            tile_mp = max(8, (tile_mp // 2) - (tile_mp // 2) % 8)
    else:
        assert tile_rows % 8 == 0, "tile_rows must be a multiple of 8"
        tile_mp = tile_rows

    Mp_pad = _round_up(Mp, tile_mp)
    M_pad = Mp_pad * G
    if M_pad != M:
        patches = jnp.pad(patches, ((0, 0), (0, M_pad - M), (0, 0)))
    patches = patches.reshape(N, Mp_pad, Gk)   # pixel-group packing: free reshape

    grid = (N, Mp_pad // tile_mp, Cp // tile_c)

    out = pl.pallas_call(
        _conv_bn_silu_kernel,
        out_shape=jax.ShapeDtypeStruct((N, Mp_pad, Cp), out_dtype),
        grid_spec=pltpu.PrefetchScalarGridSpec(
            num_scalar_prefetch=0,
            grid=grid,
            in_specs=[
                pl.BlockSpec((1, tile_mp, Gk), lambda n, m, c: (n, m, 0)),
                pl.BlockSpec((Gk, tile_c), lambda n, m, c: (0, c)),
                pl.BlockSpec((1, tile_c), lambda n, m, c: (0, c)),
            ],
            out_specs=pl.BlockSpec((1, tile_mp, tile_c),
                                   lambda n, m, c: (n, m, c)),
        ),
        compiler_params=pltpu.CompilerParams(
            dimension_semantics=("parallel", "parallel", "parallel"),
            vmem_limit_bytes=vmem_limit_bytes,
        ),
    )(patches, w_big, bias_p)

    # unpack: (N, Mp_pad, G*c2r) -> (N, M_pad, c2r) -> crop -> NHWC -> NCHW
    out = out.reshape(N, M_pad, c2r)[:, :M, :c2].reshape(N, H, W, c2)
    return jnp.transpose(out, (0, 3, 1, 2))


def conv_bn_silu_reference(x_nchw, weight_oihw, gamma, beta, running_mean,
                           running_var, *, eps=1e-5, quantize_bf16=False):
    """Module semantics in plain JAX. quantize_bf16=True mirrors the kernel's
    bf16 operand rounding (fold scale first, then cast) for a tighter check."""
    p = autopad(weight_oihw.shape[2])
    scale = gamma / jnp.sqrt(running_var + eps)
    bias = beta - running_mean * scale
    w = weight_oihw.astype(jnp.float32) * scale[:, None, None, None]
    x = x_nchw.astype(jnp.float32)
    if quantize_bf16:
        w = w.astype(jnp.bfloat16).astype(jnp.float32)
        x = x.astype(jnp.bfloat16).astype(jnp.float32)
    y = jax.lax.conv_general_dilated(
        x, w, window_strides=(1, 1), padding=[(p, p), (p, p)],
        dimension_numbers=("NCHW", "OIHW", "NCHW"),
        precision=jax.lax.Precision.HIGHEST)
    y = y + bias[None, :, None, None]
    return y * jax.nn.sigmoid(y)


if __name__ == "__main__":
    # Module config: Conv(c1=4, c2=8, k=3)  (stride=1, autopad -> p=1)
    c1, c2, k = 4, 8, 3
    N, H, W = 2, 16, 16

    key = jax.random.PRNGKey(0)
    kx, kw, kg, kb, km, kv = jax.random.split(key, 6)

    x = jax.random.normal(kx, (N, c1, H, W), dtype=jnp.float32)
    weight = jax.random.normal(kw, (c2, c1, k, k), dtype=jnp.float32) * 0.1
    gamma = 1.0 + 0.1 * jax.random.normal(kg, (c2,), dtype=jnp.float32)
    beta = 0.1 * jax.random.normal(kb, (c2,), dtype=jnp.float32)
    running_mean = 0.1 * jax.random.normal(km, (c2,), dtype=jnp.float32)
    running_var = 1.0 + 0.1 * jnp.abs(jax.random.normal(kv, (c2,), dtype=jnp.float32))

    # Auto-tiled run (G=16 pixels packed per 128-lane row, bf16 output).
    out = conv_bn_silu_pallas(x, weight, gamma, beta, running_mean, running_var)
    out = jax.block_until_ready(out)
    assert out.shape == (N, c2, H, W)
    out_f32 = out.astype(jnp.float32)

    # Smaller explicit row tile: exercises the multi-row-tile pipeline path.
    out2 = conv_bn_silu_pallas(x, weight, gamma, beta, running_mean,
                               running_var, tile_rows=8)
    out2 = jax.block_until_ready(out2)
    assert jnp.allclose(out_f32, out2.astype(jnp.float32), atol=1e-5), \
        "tile variants disagree"

    # Tight check vs a reference using the same bf16 operand rounding
    # (kernel additionally rounds the stored output to bf16).
    ref_q = conv_bn_silu_reference(x, weight, gamma, beta, running_mean,
                                   running_var, quantize_bf16=True)
    err_q = float(jnp.max(jnp.abs(out_f32 - ref_q)))
    assert jnp.allclose(out_f32, ref_q, atol=2.5e-2, rtol=2.5e-2), f"max err {err_q}"

    # Looser check vs the exact f32 module semantics.
    ref_f32 = conv_bn_silu_reference(x, weight, gamma, beta, running_mean,
                                     running_var, quantize_bf16=False)
    err_f = float(jnp.max(jnp.abs(out_f32 - ref_f32)))
    assert jnp.allclose(out_f32, ref_f32, atol=6e-2, rtol=6e-2), f"max err {err_f}"

    print("KERNEL_OK")
</pallas_src>

<mosaic_0001>
module attributes {stable_mosaic.version = 11 : i64} {
  func.func @_conv_bn_silu_kernel(%arg0: i32, %arg1: i32, %arg2: i32, %arg3: memref<1x16x576xbf16, #tpu.memory_space<vmem>>, %arg4: memref<576x128xbf16, #tpu.memory_space<vmem>>, %arg5: memref<1x128xf32, #tpu.memory_space<vmem>>, %arg6: memref<1x16x128xbf16, #tpu.memory_space<vmem>>) attributes {dimension_semantics = [#tpu.dimension_semantics<parallel>, #tpu.dimension_semantics<parallel>, #tpu.dimension_semantics<parallel>], iteration_bounds = array<i64: 2, 1, 1>, scalar_prefetch = 0 : i64, scratch_operands = 0 : i64, tpu.core_type = #tpu.core_type<tc>, window_params = [{transform_indices = @transform_0, window_bounds = array<i64: 1, 16, 576>}, {transform_indices = @transform_1, window_bounds = array<i64: 576, 128>}, {transform_indices = @transform_2, window_bounds = array<i64: 1, 128>}, {transform_indices = @transform_3, window_bounds = array<i64: 1, 16, 128>}]} {
    %c0 = arith.constant 0 : index
    %c0_0 = arith.constant 0 : index
    %c0_1 = arith.constant 0 : index
    %0 = vector.load %arg3[%c0, %c0_0, %c0_1] : memref<1x16x576xbf16, #tpu.memory_space<vmem>>, vector<1x16x576xbf16>
    %1 = vector.shape_cast %0 : vector<1x16x576xbf16> to vector<16x576xbf16>
    %c0_2 = arith.constant 0 : index
    %c0_3 = arith.constant 0 : index
    %2 = vector.load %arg4[%c0_2, %c0_3] : memref<576x128xbf16, #tpu.memory_space<vmem>>, vector<576x128xbf16>
    %cst = arith.constant dense<0.000000e+00> : vector<16x128xf32>
    %3 = tpu.matmul %1, %2, %cst {dimension_numbers = #tpu.dot_dimension_numbers<[1], [0], [0], [1], [0, 0, 1, 1], [], []>} : vector<16x576xbf16>, vector<576x128xbf16>, vector<16x128xf32> -> vector<16x128xf32>
    %c0_4 = arith.constant 0 : index
    %c0_5 = arith.constant 0 : index
    %4 = vector.load %arg5[%c0_4, %c0_5] : memref<1x128xf32, #tpu.memory_space<vmem>>, vector<1x128xf32>
    %5 = vector.broadcast %4 : vector<1x128xf32> to vector<16x128xf32>
    %6 = arith.addf %3, %5 : vector<16x128xf32>
    %7 = arith.negf %6 : vector<16x128xf32>
    %8 = math.exp %7 : vector<16x128xf32>
    %cst_6 = arith.constant 1.000000e+00 : f32
    %9 = vector.broadcast %cst_6 : f32 to vector<16x128xf32>
    %10 = arith.addf %9, %8 : vector<16x128xf32>
    %11 = arith.divf %9, %10 : vector<16x128xf32>
    %12 = arith.mulf %6, %11 : vector<16x128xf32>
    %13 = arith.truncf %12 : vector<16x128xf32> to vector<16x128xbf16>
    %c0_7 = arith.constant 0 : index
    %c0_8 = arith.constant 0 : index
    %c0_9 = arith.constant 0 : index
    %14 = vector.load %arg6[%c0_7, %c0_8, %c0_9] : memref<1x16x128xbf16, #tpu.memory_space<vmem>>, vector<1x16x128xbf16>
    %15 = vector.shape_cast %14 : vector<1x16x128xbf16> to vector<16x128xbf16>
    %16 = vector.shape_cast %13 : vector<16x128xbf16> to vector<1x16x128xbf16>
    tpu.vector_store %arg6[%c0_7, %c0_8, %c0_9], %16 {strides = array<i32>} : memref<1x16x128xbf16, #tpu.memory_space<vmem>>, vector<1x16x128xbf16>,
    return
  }
  func.func @transform_0(%arg0: i32, %arg1: i32, %arg2: i32) -> (i32, i32, i32) {
    %c0_i32 = arith.constant 0 : i32
    %c0_i32_0 = arith.constant 0 : i32
    return %arg0, %arg1, %c0_i32 : i32, i32, i32
  }
  func.func @transform_1(%arg0: i32, %arg1: i32, %arg2: i32) -> (i32, i32) {
    %c0_i32 = arith.constant 0 : i32
    %c0_i32_0 = arith.constant 0 : i32
    return %c0_i32, %arg2 : i32, i32
  }
  func.func @transform_2(%arg0: i32, %arg1: i32, %arg2: i32) -> (i32, i32) {
    %c0_i32 = arith.constant 0 : i32
    %c0_i32_0 = arith.constant 0 : i32
    return %c0_i32, %arg2 : i32, i32
  }
  func.func @transform_3(%arg0: i32, %arg1: i32, %arg2: i32) -> (i32, i32, i32) {
    %c0_i32 = arith.constant 0 : i32
    return %arg0, %arg1, %arg2 : i32, i32, i32
  }
}

</mosaic_0001>

<bundles_post_ra>
// kernel: tpu_custom_call.1
= control target key start
LH: loop header
LB: loop body
LE: loop exit
PB: predicated region body
PF: predicated region fallthrough
CT: control target
= control target key end

     0   :  { %8 = vsyncpa [#allocation3], 0  ;;  %s1532_s0 = inlined_call_operand.hbm [shape: bf16[2,16,576], index: 0, kind: input, shape index: {}]   ;;  %s1533_s1 = inlined_call_operand.hbm [shape: bf16[576,128], index: 1, kind: input, shape index: {}]   ;;  %s1534_s2 = inlined_call_operand.vmem [shape: f32[1,128], index: 2, kind: input, shape index: {}]   ;;  %s1535_s3 = inlined_call_operand.hbm [shape: bf16[2,16,128], index: 3, kind: output, shape index: {}]  }
   0x1   :  { %10 = vsyncpa [#allocation3 + $0x1], 0 }
   0x2   :  { %11 = vsyncpa [#allocation6], 0 }
   0x3   :  { %12 = vsyncpa [#allocation4], 0 }
   0x4   :  { %14 = vsyncpa [#allocation4 + $0x1], 0  ;;  %s1308_s12 = smov 0   ;;  %s1310_s13 = smov 0  }
   0x5   :  { %s1312_s14 = smov 0   ;;  %s1314_s15 = smov 0  }
   0x6   :  { %s1316_s16 = smov 0   ;;  %s1318_s17 = smov 0  }
   0x7 LB: > { %s865_s18 = sadd.s32 4294967295, %s1275_s17   ;;  %s866_s19 = sadd.s32 4294967294, %s1275_s17   ;;  %s1275_s17 = sphi %s1318_s17, %s20_s17   ;;  %s1271_s16 = sphi %s1316_s16, %s1558_s16   ;;  %s1267_s15 = sphi %s1314_s15, %s1557_s15   ;;  %s1263_s14 = sphi %s1312_s14, %s1556_s14   ;;  %s1259_s13 = sphi %s1310_s13, %s1555_s13   ;;  %s1255_s12 = sphi %s1308_s12, %s1554_s12  }
   0x8   : > { %p61_p0 = scmp.ne.s32.totalorder %s1259_s13, %s1255_s12  ;;  %p1342_p1 = scmp.eq.s32.totalorder %s865_s18, 0 }
   0x9   : > { %p1346_p2 = scmp.eq.s32.totalorder %s865_s18, 1  ;;  %p147_p3 = scmp.eq.s32.totalorder %s866_s19, 1 }
   0xa   : > { %s1540_s20 = scalar_select %p1342_p1, 1, 0 }
   0xb   : > { %s1541_s21 = scalar_select %p1346_p2, 1, 0 }
   0xc   : > { %p1352_p4 = por %p1342_p1, %p61_p0  ;;  %p867_p5 = scmp.ge.s32.totalorder %s1275_s17, 1 }
   0xd   : > { %p1357_p6 = por %p147_p3, %p61_p0  ;;  %p154_p7 = scmp.lt.s32.totalorder %s1275_s17, 3 }
   0xe   : > { %s1542_s22 = scalar_select %p1352_p4, 1, 0 }
   0xf   : > { %s1543_s23 = scalar_select %p1357_p6, 1, 0 }
  0x10   : > { %p1362_p8 = pnand %p867_p5, %p154_p7  ;;  %s1277_s25 = smov [#allocation5]  }
  0x11   : > { %s168_s26 = sshll.u32 %s1277_s25, 4  ;;  %s39_s28 = sadd.s32 1, %s1271_s16  ;;  %s169_s26 = int_to_ptr.vmem [resolvable:$true] %s168_s26 }
  0x12   : > { %s1544_s24 = scalar_select %p1362_p8, 1, 0 }
  0x13   : > { %p1007_p9 = pneg %p1362_p8  ;;  %s1131_s4 = scalar_lea.hbm %s1533_s1, 4608 }
  0x14   : > { %p1132_p12 = scmp.ne.s32.totalorder %s1533_s1, %s1131_s4  ;;  %p1138_p5 = scmp.lt.u32.totalorder %s1131_s4, %s1533_s1 }
  0x15   : > { %p1371_p11 = pnand %p1007_p9, %p1342_p1 }
  0x17   : > { %p1133_p13 = pneg %p1371_p11 }
  0x19   : > { %p1134_p0 = pnand %p1133_p13, %p1132_p12 }
  0x1b   : > { %p1135_p3 = pneg %p1134_p0 }
  0x1d   : > { %p1140_p7 = pnand %p1138_p5, %p1135_p3 }
  0x1f   : > { %1143 = shalt.err (!%p1140_p7)
}
  0x20   : > { %s1144_s9 = scalar_lea.vmem %s169_s26, 4608  ;;  %p1152_p1 = scmp.lt.s32.totalorder %s169_s26, %s169_s26 }
  0x21   : > { %p1145_p9 = scmp.ne.s32.totalorder %s169_s26, %s1144_s9  ;;  %p1153_p4 = scmp.lt.s32.totalorder %s1144_s9, %s1144_s9 }
  0x23   : > { %p1147_p10 = pnand %p1145_p9, %p1133_p13  ;;  %p1154_p8 = por %p1153_p4, %p1152_p1 }
  0x25   : > { %p1148_p6 = pneg %p1147_p10 }
  0x27   : > { %p1155_p2 = pnand %p1154_p8, %p1148_p6 }
  0x29   : > { %1158 = shalt.err (!%p1155_p2)
}
  0x2a   : > { %s1278_s10 = smov 64   ;;  %s1279_s11 = smov 4  }
  0x2b   : > { %1010 = dma.hbm_to_vmem [thread:$0]  (!%p1371_p11), %s1533_s1, 4608, %s169_s26, [#allocation6], %s1278_s10, %s1278_s10, %s1279_s11  }
  0x2c   : > { %p41_p1 = scmp.ge.s32.totalorder %s39_s28, 2  ;;  %s48_s25 = sadd.s32 1, %s1263_s14 }
  0x2d   : > { %p55_p2 = scmp.ne.s32.totalorder %s1263_s14, %s1259_s13  ;;  %p56_p4 = scmp.eq.s32.totalorder %s1275_s17, 0 }
  0x2e   : > { %s1560_s28 = smov (%p41_p1, %s39_s28), 0  ;;  %p1546_p8 = scmp.ne.s32.totalorder %s1541_s21, 0 }
  0x2f   : > { %p57_p6 = por %p56_p4, %p55_p2  ;;  %s43_s30 = ssub.s32 %s1271_s16, %s1560_s28 }
  0x30   : > { %p1400_p10 = por %p1546_p8, %p55_p2  ;;  %p1020_p12 = scmp.lt.s32.totalorder %s1275_s17, 2 }
  0x31   : > { %p46_p13 = scmp.eq.s32.totalorder %s43_s30, 0  ;;  %s188_s27 = sand.u32 1, %s1263_s14  }
  0x32   : > { %s996_s4 = smul.u32 40, %s188_s27  ;;  %p1412_p11 = pnand %p1020_p12, %p57_p6 }
  0x33   : > { %s1409_s5 = scalar_select %p46_p13, %s1263_s14, %s48_s25  }
  0x34   : > { %s997_s26 = smul.u32 640, %s1271_s16  ;;  %s192_s6 = scalar_lea.vmem [#allocation2], %s996_s4 }
  0x35   : > { %s202_s7 = sshll.u32 %s192_s6, 4  ;;  %s1423_s11 = scalar_lea.sflag [#allocation3], %s188_s27  ;;  %s1421_s7 = int_to_ptr.vmem [resolvable:$true] %s202_s7 }
  0x36   : > { %s1419_s10 = scalar_lea.hbm %s1532_s0, %s997_s26  ;;  %p1161_p3 = pneg %p1412_p11 }
  0x37   : > { %s1159_s18 = scalar_lea.hbm %s1419_s10, 640  ;;  %s1164_s30 = scalar_lea.hbm %s1532_s0, 1280 }
  0x38   : > { %p1160_p0 = scmp.ne.s32.totalorder %s1419_s10, %s1159_s18  ;;  %p1165_p9 = scmp.lt.u32.totalorder %s1419_s10, %s1532_s0 }
  0x39   : > { %p1166_p1 = scmp.lt.u32.totalorder %s1164_s30, %s1159_s18  ;;  %p1168_p4 = scmp.lt.u32.totalorder %s1159_s18, %s1419_s10 }
  0x3a   : > { %p1162_p5 = pnand %p1161_p3, %p1160_p0 }
  0x3b   : > { %p1167_p2 = por %p1166_p1, %p1165_p9 }
  0x3c   : > { %p1163_p7 = pneg %p1162_p5 }
  0x3d   : > { %p1169_p6 = por %p1168_p4, %p1167_p2 }
  0x3f   : > { %p1170_p8 = pnand %p1169_p6, %p1163_p7 }
  0x41   : > { %1173 = shalt.err (!%p1170_p8)
}
  0x42   : > { %s1174_s27 = scalar_lea.vmem %s1421_s7, 640  ;;  %s1280_s6 = smov [#allocation2]  }
  0x43   : > { %p1175_p12 = scmp.ne.s32.totalorder %s1421_s7, %s1174_s27  ;;  %s1179_s9 = sshll.u32 %s1280_s6, 4  ;;  %s1180_s9 = int_to_ptr.vmem [resolvable:$false] %s1179_s9 }
  0x44   : > { %s1181_s21 = scalar_lea.vmem %s1180_s9, 1280  ;;  %p1182_p5 = scmp.lt.s32.totalorder %s1421_s7, %s1180_s9 }
  0x45   : > { %p1177_p13 = pnand %p1175_p12, %p1161_p3  ;;  %p1183_p9 = scmp.lt.s32.totalorder %s1181_s21, %s1174_s27 }
  0x47   : > { %p1178_p0 = pneg %p1177_p13  ;;  %p1184_p1 = por %p1183_p9, %p1182_p5 }
  0x49   : > { %p1185_p2 = pnand %p1184_p1, %p1178_p0 }
  0x4b   : > { %1188 = shalt.err (!%p1185_p2)
}
  0x4c   : > { %s1281_s18 = smov 320   ;;  %s1282_s19 = smov 20  }
  0x4d   : > { %1014 = dma.hbm_to_vmem [thread:$0]  (!%p1412_p11), %s1419_s10, 640, %s1421_s7, %s1423_s11, %s1281_s18, %s1281_s18, %s1282_s19  }
  0x4e   : > { %p1549_p3 = scmp.ne.s32.totalorder %s1544_s24, 0 }
  0x4f   : > { %s1454_s25 = sand.u32 (!%p1549_p3), 1, %s1259_s13   ;;  %p1550_p7 = scmp.ne.s32.totalorder (!%p1549_p3), %s1542_s22, 0 }
  0x50   : > { %214 = sbr.rel (%p1549_p3) target bundleno = 401 (0x191), region = 32  ;;  %s217_s4 = scalar_lea.sflag (!%p1549_p3), [#allocation3], %s1454_s25 }
  0x51   : > { %s998_s30 = smul.u32 (!%p1549_p3), 40, %s1454_s25 }
  0x53   : > { %s1458_s26 = scalar_lea.vmem (!%p1549_p3), [#allocation2], %s998_s30 }
  0x57   : > { %1242 = dma.done.wait (%p1550_p7), %s217_s4, 640  }
  0x58   : > { %1244 = vsyncadd (%p1550_p7), %s217_s4, 4294966656  ;;  %p1551_p11 = scmp.ne.s32.totalorder %s1540_s20, 0 }
  0x5a   : > { %1246 = dma.done.wait (%p1551_p11), [#allocation6], 4608  }
  0x5b   : > { %1248 = vsyncadd (%p1551_p11), [#allocation6], 4294962688  ;;  %v1080_v0 = vld [vmem:[#allocation5 + $0x40] sm:$0xff]   ;;  %v1084_v4 = vld [vmem:[#allocation5 + $0x48] sm:$0xff]   ;;  %v1283_v33 = vmov 0.0   ;;  %vm1284_vm0 = vmmov 0  }
  0x5c   : > { %v1081_v1 = vld [vmem:[#allocation5] sm:$0xff]   ;;  %935 = vmatprep.subr.bf16.mxu0 %v1080_v0  ;;  %v1085_v5 = vld [vmem:[#allocation5 + $0x8] sm:$0xff]   ;;  %v1088_v8 = vld [vmem:[#allocation5 + $0x50] sm:$0xff]   ;;  %vm582_vm1 = vcmask 523264   ;;  %s874_s24 = sshll.u32 %s1454_s25, 3  ;;  %s929_s7 = sshll.u32 %s1267_s15, 7 }
  0x5d   : > { %v1082_v2 = vld [vmem:[#allocation5 + $0xc0] sm:$0xff]   ;;  %936 = vmatpush3.bf16.msra.mxu0 %v1081_v1  ;;  %v1086_v6 = vld [vmem:[#allocation5 + $0xc8] sm:$0xff]   ;;  %v1089_v9 = vld [vmem:[#allocation5 + $0x10] sm:$0xff]   ;;  %s249_s8 = scalar_lea.vmem [#allocation7], %s874_s24  ;;  %s1481_s6 = scalar_lea.hbm %s1535_s3, %s929_s7 }
  0x5e   : > { %v1083_v3 = vld [vmem:[#allocation5 + $0x80] sm:$0xff]   ;;  %957 = vmatprep.subr.bf16.mxu1 %v1082_v2  ;;  %937 = vmatprep.subr.bf16.mxu0 %v1084_v4  ;;  %v1087_v7 = vld [vmem:[#allocation5 + $0x88] sm:$0xff]   ;;  %v1090_v10 = vld [vmem:[#allocation5 + $0xd0] sm:$0xff]   ;;  %s750_s10 = sshll.u32 %s249_s8, 4  ;;  %s734_s9 = scalar_lea.sflag [#allocation4], %s1454_s25  ;;  %s1483_s10 = int_to_ptr.vmem [resolvable:$true] %s750_s10 }
  0x5f   : > { %958 = vmatpush3.bf16.msra.mxu1 %v1083_v3  ;;  %v1091_v11 = vld [vmem:[#allocation5 + $0x90] sm:$0xff]   ;;  %v1092_v12 = vld [vmem:[#allocation5 + $0x58] sm:$0xff]   ;;  %v1096_v16 = vld [vmem:[#allocation5 + $0x60] sm:$0xff]   ;;  %s1189_s21 = scalar_lea.vmem %s1483_s10, 128  ;;  %s1285_s15 = smov [#allocation7]  }
  0x60   : > { %959 = vmatprep.subr.bf16.mxu1 %v1086_v6  ;;  %v1093_v13 = vld [vmem:[#allocation5 + $0x18] sm:$0xff]   ;;  %v1097_v17 = vld [vmem:[#allocation5 + $0x20] sm:$0xff]   ;;  %v1100_v20 = vld [vmem:[#allocation5 + $0x68] sm:$0xff]   ;;  %p1190_p4 = scmp.ne.s32.totalorder %s1483_s10, %s1189_s21  ;;  %s1193_s18 = sshll.u32 %s1285_s15, 4  ;;  %s1194_s18 = int_to_ptr.vmem [resolvable:$false] %s1193_s18 }
  0x61   : > { %938 = vmatpush3.bf16.msra.mxu0 %v1085_v5  ;;  %v1094_v14 = vld [vmem:[#allocation5 + $0xd8] sm:$0xff]   ;;  %v1098_v18 = vld [vmem:[#allocation5 + $0xe0] sm:$0xff]   ;;  %v1101_v21 = vld [vmem:[#allocation5 + $0x28] sm:$0xff]   ;;  %s1195_s19 = scalar_lea.vmem %s1194_s18, 256  ;;  %p1196_p12 = scmp.lt.s32.totalorder %s1483_s10, %s1194_s18 }
  0x62   : > { %939 = vmatprep.subr.bf16.mxu0 %v1088_v8  ;;  %v1095_v15 = vld [vmem:[#allocation5 + $0x98] sm:$0xff]   ;;  %v1099_v19 = vld [vmem:[#allocation5 + $0xa0] sm:$0xff]   ;;  %v1102_v22 = vld [vmem:[#allocation5 + $0xe8] sm:$0xff]   ;;  %p1191_p6 = pnand %p1190_p4, %p1400_p10  ;;  %p1197_p13 = scmp.lt.s32.totalorder %s1195_s19, %s1189_s21 }
  0x63   : > { %960 = vmatpush3.bf16.msra.mxu1 %v1087_v7  ;;  %v1103_v23 = vld [vmem:[#allocation5 + $0xa8] sm:$0xff]   ;;  %v1104_v24 = vld [vmem:[#allocation5 + $0x70] sm:$0xff]   ;;  %v1108_v28 = vld [vmem:[#allocation5 + $0x78] sm:$0xff]  }
  0x64   : > { %961 = vmatprep.subr.bf16.mxu1 %v1090_v10  ;;  %v1105_v25 = vld [vmem:[#allocation5 + $0x30] sm:$0xff]   ;;  %v1109_v29 = vld [vmem:[#allocation5 + $0x38] sm:$0xff]   ;;  %v1118_v37 = vld [vmem:[#allocation5 + $0x100] sm:$0xff]   ;;  %p1192_p8 = pneg %p1191_p6  ;;  %p1198_p0 = por %p1197_p13, %p1196_p12 }
  0x65   : > { %940 = vmatpush3.bf16.msra.mxu0 %v1089_v9  ;;  %v1106_v26 = vld [vmem:[#allocation5 + $0xf0] sm:$0xff]   ;;  %v1110_v30 = vld [vmem:[#allocation5 + $0xf8] sm:$0xff]   ;;  %v1119_v38 = vld [vmem:[#allocation5 + $0x108] sm:$0xff]  }
  0x66   : > { %941 = vmatprep.subr.bf16.mxu0 %v1092_v12  ;;  %v1107_v27 = vld [vmem:[#allocation5 + $0xb0] sm:$0xff]   ;;  %v1114_v34 = vld [vmem:[#allocation5 + $0xb8] sm:$0xff]   ;;  %p1199_p5 = pnand %p1198_p0, %p1192_p8 }
  0x67   : > { %962 = vmatpush3.bf16.msra.mxu1 %v1091_v11  ;;  %v1111_v31 = vld [vmem:[%s1458_s26] ss:$20 sps:$4 sm:$0xff]   ;;  %v1113_v32 = vld [vmem:[%s1458_s26 + $0x4] ss:$20 sps:$4 sm:$0xff]   ;;  %v1115_v35 = vld [vmem:[%s1458_s26 + $0x8] ss:$20 sps:$4 sm:$0xff]  }
  0x68   : > { %963 = vmatprep.subr.bf16.mxu1 %v1094_v14  ;;  %618 = vmatprep.mubr.bf16.mxu0 %v1113_v32  ;;  %v1117_v36 = vld [vmem:[%s1458_s26 + $0xc] ss:$20 sps:$4 sm:$0xff]   ;;  %v1122_v41 = vld [vmem:[%s1458_s26 + $0x10] ss:$20 sps:$4 sm:$0xff]  }
  0x69   : > { %942 = vmatpush3.bf16.msra.mxu0 %v1093_v13  ;;  %659 = vmatprep.mubr.bf16.mxu1 %v1117_v36  ;;  %v1120_v39 = vld [vmem:[#allocation5 + $0x110] sm:$0xff]   ;;  %v1121_v40 = vld [vmem:[#allocation5 + $0x118] sm:$0xff]  }
  0x6a   : > { %943 = vmatprep.subr.bf16.mxu0 %v1096_v16  ;;  %v875_v43 = vld [vmem:[%s1534_s2] ss:$0 sm:$0xff] }
  0x6b   : > { %964 = vmatpush3.bf16.msra.mxu1 %v1095_v15 }
  0x6c   : > { %965 = vmatprep.subr.bf16.mxu1 %v1098_v18 }
  0x6d   : > { %944 = vmatpush3.bf16.msra.mxu0 %v1097_v17 }
  0x6e   : > { %945 = vmatprep.subr.bf16.mxu0 %v1100_v20 }
  0x6f   : > { %966 = vmatpush3.bf16.msra.mxu1 %v1099_v19 }
  0x70   : > { %967 = vmatprep.subr.bf16.mxu1 %v1102_v22 }
  0x71   : > { %946 = vmatpush3.bf16.msra.mxu0 %v1101_v21 }
  0x72   : > { %947 = vmatprep.subr.bf16.mxu0 %v1104_v24 }
  0x73   : > { %968 = vmatpush3.bf16.msra.mxu1 %v1103_v23 }
  0x74   : > { %969 = vmatprep.subr.bf16.mxu1 %v1106_v26 }
  0x75   : > { %948 = vmatpush3.bf16.msra.mxu0 %v1105_v25 }
  0x76   : > { %949 = vmatprep.subr.bf16.mxu0 %v1108_v28 }
  0x77   : > { %970 = vmatpush3.bf16.msra.mxu1 %v1107_v27 }
  0x78   : > { %971 = vmatprep.subr.bf16.mxu1 %v1110_v30 }
  0x79   : > { %950 = vmatpush3.bf16.msra.mxu0 %v1109_v29 }
  0x7a   : > { %984 = vmatprep.subr.bf16.mxu0 %v1283_v33 }
  0x7b   : > { %972 = vmatpush3.bf16.msra.mxu1 %v1114_v34 }
  0x7c   : > { %619 = vmatmul.mubr.bf16.vlgmr.msra.gmra.mrb[0].mxu0 %v1111_v31 }
  0x7d   : > { %992 = vmatprep.mubr.msk.bf16.mxu0 %vm1284_vm0, %v1283_v33  ;;  %985 = vmatpush3.bf16.msra.mxu0 %v1118_v37 }
  0x7e   : > { %660 = vmatmul.mubr.bf16.vlgmr.msra.gmra.mrb[0].mxu1 %v1115_v35  ;;  %986 = vmatprep.subr.bf16.mxu0 %v1283_v33 }
  0x81   : > { %987 = vmatpush3.bf16.msra.mxu0 %v1119_v38 }
  0x82   : > { %988 = vmatprep.subr.bf16.mxu0 %v1283_v33 }
  0x85   : > { %989 = vmatpush3.bf16.msra.mxu0 %v1120_v39 }
  0x86   : > { %990 = vmatprep.subr.bf16.mxu0 %v1283_v33 }
  0x89   : > { %991 = vmatpush3.bf16.msra.mxu0 %v1121_v40 }
  0x8c   : > { %993 = vmatmul.mubr.msk.bf16.vlgmr.msra.gmra.mrb[4].mxu0 %vm582_vm1, %v1122_v41 }
 0x14f   : > { %v951_v42 = vpop.f32.mrb[0].mxu0 }
 0x150   : > { %v952_v44 = vpop.f32.mrb[1].mxu0 }
 0x151   : > { %v953_v45 = vadd.f32 %v952_v44, %v951_v42  ;;  %v954_v46 = vpop.f32.mrb[2].mxu0  ;;  %v973_v47 = vpop.f32.mrb[0].mxu1 }
 0x152   : > { %v955_v48 = vpop.f32.mrb[3].mxu0  ;;  %v974_v51 = vpop.f32.mrb[1].mxu1 }
 0x153   : > { %v621_v49 = vadd.f32 %v953_v45, %v875_v43  ;;  %v956_v50 = vadd.f32 %v955_v48, %v954_v46  ;;  %v975_v52 = vadd.f32 %v974_v51, %v973_v47  ;;  %v976_v53 = vpop.f32.mrb[2].mxu1 }
 0x154   : > { %v977_v55 = vpop.f32.mrb[3].mxu1 }
 0x155   : > { %v624_v54 = vadd.f32 %v956_v50, %v875_v43  ;;  %v978_v56 = vadd.f32 %v977_v55, %v976_v53  ;;  %v662_v57 = vadd.f32 %v975_v52, %v621_v49 }
 0x157   : > { %v665_v58 = vadd.f32 %v978_v56, %v624_v54 }
 0x15f   : > { %v702_v59 = vpop.f32.mrb[4].mxu0 }
 0x160   : > { %v703_v60 = vadd.f32 %v702_v59, %v662_v57  ;;  %v994_v61 = vpop.f32.mrb[5].mxu0 }
 0x161   : > { %v705_v62 = vpop.f32.mrb[6].mxu0 }
 0x162   : > { %v918_v63 = vmul.f32 -1.442695, %v703_v60  ;;  %v706_v0 = vadd.f32 %v705_v62, %v665_v58  ;;  %v995_v1 = vpop.f32.mrb[7].mxu0 }
 0x164   : > { %1123 = vpow2.f32 %v918_v63  ;;  %v919_v2 = vmul.f32 -1.442695, %v706_v0 }
 0x166   : > { %1125 = vpow2.f32 %v919_v2 }
 0x16e   : > { %v1124_v3 = vpop.eup %1123 }
 0x16f   : > { %v715_v4 = vadd.f32 1.0, %v1124_v3 }
 0x170   : > { %v1126_v5 = vpop.eup %1125 }
 0x171   : > { %1127 = vrcp.f32 %v715_v4  ;;  %v716_v6 = vadd.f32 1.0, %v1126_v5 }
 0x173   : > { %1129 = vrcp.f32 %v716_v6 }
 0x17b   : > { %v1128_v7 = vpop.eup %1127 }
 0x17c   : > { %v721_v9 = vmul.f32 %v1128_v7, %v703_v60 }
 0x17d   : > { %v1130_v8 = vpop.eup %1129 }
 0x17e   : > { %v722_v10 = vmul.f32 %v1130_v8, %v706_v0 }
 0x180   : > { %v933_v11 = vpack.c.bf16 %v722_v10, %v721_v9 }
 0x182   : > { %934 = vst [vmem:[%s249_s8] sm:$0xff] %v933_v11  }
 0x183   : > { %1202 = shalt.err (!%p1199_p5)
}
 0x184   : > { %s1203_s30 = scalar_lea.hbm %s1481_s6, 128  ;;  %s1207_s20 = scalar_lea.hbm %s1535_s3, 256 }
 0x185   : > { %p1204_p9 = scmp.ne.s32.totalorder %s1481_s6, %s1203_s30  ;;  %p1208_p3 = scmp.lt.u32.totalorder %s1481_s6, %s1535_s3 }
 0x186   : > { %p1209_p7 = scmp.lt.u32.totalorder %s1207_s20, %s1203_s30  ;;  %p1211_p4 = scmp.lt.u32.totalorder %s1203_s30, %s1481_s6 }
 0x187   : > { %p1205_p1 = pnand %p1204_p9, %p1400_p10 }
 0x188   : > { %p1210_p11 = por %p1209_p7, %p1208_p3 }
 0x189   : > { %p1206_p2 = pneg %p1205_p1 }
 0x18a   : > { %p1212_p6 = por %p1211_p4, %p1210_p11 }
 0x18c   : > { %p1213_p8 = pnand %p1212_p6, %p1206_p2 }
 0x18e   : > { %1216 = shalt.err (!%p1213_p8)
}
 0x18f   : > { %s1286_s7 = smov 64   ;;  %s1287_s8 = smov 4  }
 0x190   : > { %1005 = dma.vmem_to_hbm [thread:$0]  (%p1400_p10), %s1483_s10, 128, %s1481_s6, %s734_s9, %s1286_s7, %s1286_s7, %s1287_s8  }
 0x191 PF: > { %s765_s11 = sand.u32 1, %s1255_s12   ;;  %p1552_p12 = scmp.ne.s32.totalorder %s1543_s23, 0 }
 0x192   : > { %p1553_p13 = scmp.ge.s32.totalorder %s1275_s17, 2  ;;  %s766_s27 = scalar_lea.sflag [#allocation4], %s765_s11 }
 0x194   : > { %p1016_p0 = pnand %p1553_p13, %p1552_p12 }
 0x196   : > { %1250 = dma.done.wait (!%p1016_p0), %s766_s27, 128  }
 0x197   : > { %1252 = vsyncadd (!%p1016_p0), %s766_s27, 4294967168  ;;  %s20_s17 = sadd.s32 1, %s1275_s17   ;;  %s1554_s12 = smov %s1259_s13 }
 0x198   : > { %p17_p5 = scmp.ge.s32.totalorder %s20_s17, 4   ;;  %s1555_s13 = smov %s1263_s14 }
 0x199   : > { %s1556_s14 = smov %s1409_s5  ;;  %s1557_s15 = smov %s1271_s16 }
 0x19a   : > { %s1558_s16 = smov %s1560_s28  ;;  %19 = sbr.rel (!%p17_p5) target bundleno = 7 (0x7), region = 85 }
 0x1a1   :  { %771 = vsyncpa [#allocation3], 1 }
 0x1a2   :  { %773 = vsyncpa [#allocation3 + $0x1], 1 }
 0x1a3   :  { %774 = vsyncpa [#allocation6], 1 }
 0x1a4   :  { %775 = vsyncpa [#allocation4], 1 }
 0x1a5   :  { %777 = vsyncpa [#allocation4 + $0x1], 1 }

</bundles_post_ra>
